<compile_context>
chip_gen: v7x
topology: tpu7x:2x2x1
jax: 0.10.0
libtpu: 0.0.40
codegen_flags: <defaults>
</compile_context>

<pallas_src>
import functools

import numpy as np
import jax
import jax.numpy as jnp
from jax import lax
from jax.experimental import pallas as pl
from jax.experimental.pallas import tpu as pltpu


def _decoder_kernel(x_ref,
                    w1_ref, t1_ref,
                    a_ref, b_ref, c_ref, d_ref, t2_ref,
                    w3_ref, t3_ref,
                    out_ref, *, height, width, c_mid):
    H, W = height, width
    HW = H * W
    C = c_mid

    x = x_ref[0]                                             # (C_in, HW) f32

    # ---- conv1 (1x1) + BN1 (folded) + ReLU -------------------------------
    f1 = jnp.dot(w1_ref[...], x, preferred_element_type=jnp.float32)
    f1 = jnp.maximum(f1 + t1_ref[...], 0.0)                  # (C, HW)

    # ---- shifted feature maps needed by the stride-2 transposed conv -----
    def shift(a, n):
        # out[:, p] = a[:, p + n], zero past the end of the flat spatial axis
        pad = jnp.zeros((a.shape[0], n), a.dtype)
        return jnp.concatenate([a[:, n:], pad], axis=1)

    col = lax.broadcasted_iota(jnp.int32, (1, HW), 1) % W
    col_ok = (col != (W - 1)).astype(f1.dtype)               # kill wrap at j=W-1

    f_sj = shift(f1, 1) * col_ok                             # f1[:, i, j+1]
    f_si = shift(f1, W)                                      # f1[:, i+1, j]
    f_sij = shift(f1, W + 1) * col_ok                        # f1[:, i+1, j+1]

    # ---- deconv2 taps as matmuls (BN2 scale folded into the weights) -----
    za = jnp.dot(a_ref[...], f1, preferred_element_type=jnp.float32)     # (4C, HW)
    zb = jnp.dot(b_ref[...], f_sj, preferred_element_type=jnp.float32)   # (2C, HW)
    zc = jnp.dot(c_ref[...], f_si, preferred_element_type=jnp.float32)   # (2C, HW)
    zd = jnp.dot(d_ref[...], f_sij, preferred_element_type=jnp.float32)  # (C,  HW)

    t2 = t2_ref[...]
    g_ee = jnp.maximum(za[0 * C:1 * C] + t2, 0.0)                                  # even row, even col
    g_eo = jnp.maximum(za[1 * C:2 * C] + zb[0:C] + t2, 0.0)                        # even row, odd col
    g_oe = jnp.maximum(za[2 * C:3 * C] + zc[0:C] + t2, 0.0)                        # odd row, even col
    g_oo = jnp.maximum(za[3 * C:4 * C] + zb[C:2 * C] + zc[C:2 * C] + zd + t2, 0.0) # odd row, odd col

    # ---- conv3 (1x1) + BN3 + ReLU on all 4 parity planes in one matmul ---
    g = jnp.concatenate([g_ee, g_eo, g_oe, g_oo], axis=1)    # (C, 4*HW)
    o = jnp.dot(w3_ref[...], g, preferred_element_type=jnp.float32)
    o = jnp.maximum(o + t3_ref[...], 0.0)                    # (nf, 4*HW)

    out_ref[0, 0, :, :] = o[:, 0 * HW:1 * HW].astype(out_ref.dtype)
    out_ref[0, 1, :, :] = o[:, 1 * HW:2 * HW].astype(out_ref.dtype)
    out_ref[0, 2, :, :] = o[:, 2 * HW:3 * HW].astype(out_ref.dtype)
    out_ref[0, 3, :, :] = o[:, 3 * HW:4 * HW].astype(out_ref.dtype)


def decoder_block(x, params, *, eps=1e-5):
    """x: (B, C_in, H, W) f32.  params: PyTorch-layout parameter dict.
    Returns (B, n_filters, 2H, 2W) f32 (inference-mode BatchNorm)."""
    B, C_in, H, W = x.shape
    HW = H * W
    c_mid = params["conv1_w"].shape[0]
    nf = params["conv3_w"].shape[0]

    def bn_fold(g, b, m, v):
        s = g / jnp.sqrt(v + eps)
        return s, b - s * m

    # conv1 + bn1 folded
    s1, sh1 = bn_fold(params["bn1_g"], params["bn1_b"], params["bn1_m"], params["bn1_v"])
    w1 = params["conv1_w"][:, :, 0, 0] * s1[:, None]                    # (c_mid, C_in)
    t1 = (s1 * params["conv1_b"] + sh1)[:, None]                        # (c_mid, 1)

    # deconv2 + bn2 folded.  deconv weight layout: (c_in, c_out, kh, kw)
    s2, sh2 = bn_fold(params["bn2_g"], params["bn2_b"], params["bn2_m"], params["bn2_v"])
    wd = params["deconv2_w"]

    def tap(kh, kw):                                                    # (c_out, c_in)
        return s2[:, None] * wd[:, :, kh, kw].T

    A = jnp.concatenate([tap(1, 1), tap(1, 2), tap(2, 1), tap(2, 2)], axis=0)  # acts on f1
    Bm = jnp.concatenate([tap(1, 0), tap(2, 0)], axis=0)                       # acts on f1[.., j+1]
    Cm = jnp.concatenate([tap(0, 1), tap(0, 2)], axis=0)                       # acts on f1[.., i+1, j]
    Dm = tap(0, 0)                                                             # acts on f1[.., i+1, j+1]
    t2 = (s2 * params["deconv2_b"] + sh2)[:, None]

    # conv3 + bn3 folded
    s3, sh3 = bn_fold(params["bn3_g"], params["bn3_b"], params["bn3_m"], params["bn3_v"])
    w3 = params["conv3_w"][:, :, 0, 0] * s3[:, None]
    t3 = (s3 * params["conv3_b"] + sh3)[:, None]

    x_flat = x.reshape(B, C_in, HW)

    kernel = functools.partial(_decoder_kernel, height=H, width=W, c_mid=c_mid)

    def const_spec(arr):
        return pl.BlockSpec(arr.shape, lambda b: (0, 0))

    in_specs = [
        pl.BlockSpec((1, C_in, HW), lambda b: (b, 0, 0)),
        const_spec(w1), const_spec(t1),
        const_spec(A), const_spec(Bm), const_spec(Cm), const_spec(Dm),
        const_spec(t2),
        const_spec(w3), const_spec(t3),
    ]
    out_spec = pl.BlockSpec((1, 4, nf, HW), lambda b: (b, 0, 0, 0))

    out = pl.pallas_call(
        kernel,
        out_shape=jax.ShapeDtypeStruct((B, 4, nf, HW), x.dtype),
        grid=(B,),
        in_specs=in_specs,
        out_specs=out_spec,
        compiler_params=pltpu.CompilerParams(
            dimension_semantics=("parallel",),
            vmem_limit_bytes=32 * 1024 * 1024),
    )(x_flat, w1, t1, A, Bm, Cm, Dm, t2, w3, t3)

    # parity-major (B, p, q, nf, H, W) -> (B, nf, 2H, 2W): pure layout plumbing.
    y = out.reshape(B, 2, 2, nf, H, W)
    y = jnp.transpose(y, (0, 3, 4, 1, 5, 2))
    return y.reshape(B, nf, 2 * H, 2 * W)


def _reference(x, p, eps=1e-5):
    """Pure-JAX reference matching the PyTorch module (eval-mode BN)."""
    hp = lax.Precision.HIGHEST

    def bn(y, g, b, m, v):
        return (y - m[None, :, None, None]) / jnp.sqrt(v[None, :, None, None] + eps) \
            * g[None, :, None, None] + b[None, :, None, None]

    y = jnp.einsum('oc,bchw->bohw', p["conv1_w"][:, :, 0, 0], x, precision=hp) \
        + p["conv1_b"][None, :, None, None]
    y = jnp.maximum(bn(y, p["bn1_g"], p["bn1_b"], p["bn1_m"], p["bn1_v"]), 0.0)

    # ConvTranspose2d(k=3, s=2, p=1, output_padding=1) == lhs-dilated conv with
    # spatially flipped, (in,out)-transposed kernel and padding (1, 2).
    w_t = jnp.flip(p["deconv2_w"], axis=(2, 3)).transpose(1, 0, 2, 3)
    y = lax.conv_general_dilated(
        y, w_t, window_strides=(1, 1), padding=((1, 2), (1, 2)),
        lhs_dilation=(2, 2), rhs_dilation=(1, 1),
        dimension_numbers=('NCHW', 'OIHW', 'NCHW'), precision=hp) \
        + p["deconv2_b"][None, :, None, None]
    y = jnp.maximum(bn(y, p["bn2_g"], p["bn2_b"], p["bn2_m"], p["bn2_v"]), 0.0)

    y = jnp.einsum('oc,bchw->bohw', p["conv3_w"][:, :, 0, 0], y, precision=hp) \
        + p["conv3_b"][None, :, None, None]
    y = jnp.maximum(bn(y, p["bn3_g"], p["bn3_b"], p["bn3_m"], p["bn3_v"]), 0.0)
    return y


if __name__ == "__main__":
    B, C_in, H, W = 2, 16, 16, 16
    c_mid, nf = C_in // 4, 8

    key = jax.random.PRNGKey(0)
    ks = jax.random.split(key, 20)

    def u(k, shape, bound):
        return jax.random.uniform(k, shape, jnp.float32, -bound, bound)

    x = jax.random.normal(ks[0], (B, C_in, H, W), dtype=jnp.float32)

    params = dict(
        conv1_w=u(ks[1], (c_mid, C_in, 1, 1), 1.0 / np.sqrt(C_in)),
        conv1_b=u(ks[2], (c_mid,), 1.0 / np.sqrt(C_in)),
        deconv2_w=u(ks[3], (c_mid, c_mid, 3, 3), 1.0 / np.sqrt(c_mid * 9)),
        deconv2_b=u(ks[4], (c_mid,), 1.0 / np.sqrt(c_mid * 9)),
        conv3_w=u(ks[5], (nf, c_mid, 1, 1), 1.0 / np.sqrt(c_mid)),
        conv3_b=u(ks[6], (nf,), 1.0 / np.sqrt(c_mid)),
        bn1_g=jax.random.uniform(ks[7], (c_mid,), jnp.float32, 0.5, 1.5),
        bn1_b=u(ks[8], (c_mid,), 0.1),
        bn1_m=u(ks[9], (c_mid,), 0.1),
        bn1_v=jax.random.uniform(ks[10], (c_mid,), jnp.float32, 0.5, 1.5),
        bn2_g=jax.random.uniform(ks[11], (c_mid,), jnp.float32, 0.5, 1.5),
        bn2_b=u(ks[12], (c_mid,), 0.1),
        bn2_m=u(ks[13], (c_mid,), 0.1),
        bn2_v=jax.random.uniform(ks[14], (c_mid,), jnp.float32, 0.5, 1.5),
        bn3_g=jax.random.uniform(ks[15], (nf,), jnp.float32, 0.5, 1.5),
        bn3_b=u(ks[16], (nf,), 0.1),
        bn3_m=u(ks[17], (nf,), 0.1),
        bn3_v=jax.random.uniform(ks[18], (nf,), jnp.float32, 0.5, 1.5),
    )

    out = decoder_block(x, params)
    out = jax.block_until_ready(out)

    assert out.shape == (B, nf, 2 * H, 2 * W), out.shape
    assert out.dtype == jnp.float32

    ref = _reference(x, params)
    err = float(jnp.max(jnp.abs(out - ref)))
    assert err < 2e-2, f"max abs err {err}"

    print("KERNEL_OK")
</pallas_src>

<mosaic_0001>
module attributes {stable_mosaic.version = 11 : i64} {
  func.func @_decoder_kernel(%arg0: i32, %arg1: memref<1x16x256xf32, #tpu.memory_space<vmem>>, %arg2: memref<4x16xf32, #tpu.memory_space<vmem>>, %arg3: memref<4x1xf32, #tpu.memory_space<vmem>>, %arg4: memref<16x4xf32, #tpu.memory_space<vmem>>, %arg5: memref<8x4xf32, #tpu.memory_space<vmem>>, %arg6: memref<8x4xf32, #tpu.memory_space<vmem>>, %arg7: memref<4x4xf32, #tpu.memory_space<vmem>>, %arg8: memref<4x1xf32, #tpu.memory_space<vmem>>, %arg9: memref<8x4xf32, #tpu.memory_space<vmem>>, %arg10: memref<8x1xf32, #tpu.memory_space<vmem>>, %arg11: memref<1x4x8x256xf32, #tpu.memory_space<vmem>>) attributes {dimension_semantics = [#tpu.dimension_semantics<parallel>], iteration_bounds = array<i64: 2>, scalar_prefetch = 0 : i64, scratch_operands = 0 : i64, tpu.core_type = #tpu.core_type<tc>, window_params = [{transform_indices = @transform_0, window_bounds = array<i64: 1, 16, 256>}, {pipeline_mode = #tpu.pipeline_mode<synchronous>, transform_indices = @transform_1, window_bounds = array<i64: 4, 16>}, {pipeline_mode = #tpu.pipeline_mode<synchronous>, transform_indices = @transform_2, window_bounds = array<i64: 4, 1>}, {pipeline_mode = #tpu.pipeline_mode<synchronous>, transform_indices = @transform_3, window_bounds = array<i64: 16, 4>}, {pipeline_mode = #tpu.pipeline_mode<synchronous>, transform_indices = @transform_4, window_bounds = array<i64: 8, 4>}, {pipeline_mode = #tpu.pipeline_mode<synchronous>, transform_indices = @transform_5, window_bounds = array<i64: 8, 4>}, {pipeline_mode = #tpu.pipeline_mode<synchronous>, transform_indices = @transform_6, window_bounds = array<i64: 4, 4>}, {pipeline_mode = #tpu.pipeline_mode<synchronous>, transform_indices = @transform_7, window_bounds = array<i64: 4, 1>}, {pipeline_mode = #tpu.pipeline_mode<synchronous>, transform_indices = @transform_8, window_bounds = array<i64: 8, 4>}, {pipeline_mode = #tpu.pipeline_mode<synchronous>, transform_indices = @transform_9, window_bounds = array<i64: 8, 1>}, {transform_indices = @transform_10, window_bounds = array<i64: 1, 4, 8, 256>}]} {
    %c0 = arith.constant 0 : index
    %c0_0 = arith.constant 0 : index
    %c0_1 = arith.constant 0 : index
    %0 = vector.load %arg1[%c0, %c0_0, %c0_1] : memref<1x16x256xf32, #tpu.memory_space<vmem>>, vector<1x16x256xf32>
    %1 = vector.shape_cast %0 : vector<1x16x256xf32> to vector<16x256xf32>
    %c0_2 = arith.constant 0 : index
    %c0_3 = arith.constant 0 : index
    %2 = vector.load %arg2[%c0_2, %c0_3] : memref<4x16xf32, #tpu.memory_space<vmem>>, vector<4x16xf32>
    %cst = arith.constant dense<0.000000e+00> : vector<4x256xf32>
    %3 = tpu.matmul %2, %1, %cst {dimension_numbers = #tpu.dot_dimension_numbers<[1], [0], [0], [1], [0, 0, 1, 1], [], []>} : vector<4x16xf32>, vector<16x256xf32>, vector<4x256xf32> -> vector<4x256xf32>
    %c0_4 = arith.constant 0 : index
    %c0_5 = arith.constant 0 : index
    %4 = vector.load %arg3[%c0_4, %c0_5] : memref<4x1xf32, #tpu.memory_space<vmem>>, vector<4x1xf32>
    %5 = vector.broadcast %4 : vector<4x1xf32> to vector<4x256xf32>
    %6 = arith.addf %3, %5 : vector<4x256xf32>
    %cst_6 = arith.constant 0.000000e+00 : f32
    %7 = vector.broadcast %cst_6 : f32 to vector<4x256xf32>
    %8 = arith.maximumf %6, %7 : vector<4x256xf32>
    %9 = tpu.iota {dimensions = array<i32: 1>} : vector<1x256xi32>
    %c16_i32 = arith.constant 16 : i32
    %c0_i32 = arith.constant 0 : i32
    %10 = arith.cmpi eq, %c16_i32, %c0_i32 : i32
    %c1_i32 = arith.constant 1 : i32
    %11 = arith.select %10, %c1_i32, %c16_i32 : i32
    %12 = vector.broadcast %11 : i32 to vector<1x256xi32>
    %13 = arith.remsi %9, %12 : vector<1x256xi32>
    %c0_i32_7 = arith.constant 0 : i32
    %14 = vector.broadcast %c0_i32_7 : i32 to vector<1x256xi32>
    %15 = arith.cmpi ne, %13, %14 : vector<1x256xi32>
    %c0_i32_8 = arith.constant 0 : i32
    %16 = vector.broadcast %c0_i32_8 : i32 to vector<1x256xi32>
    %17 = arith.cmpi slt, %13, %16 : vector<1x256xi32>
    %c0_i32_9 = arith.constant 0 : i32
    %18 = arith.cmpi slt, %11, %c0_i32_9 : i32
    %19 = vector.broadcast %18 : i1 to vector<1x256xi1>
    %20 = vector.broadcast %19 : vector<1x256xi1> to vector<1x256xi1>
    %21 = arith.xori %17, %20 : vector<1x256xi1>
    %22 = arith.andi %21, %15 : vector<1x256xi1>
    %23 = vector.broadcast %11 : i32 to vector<1x256xi32>
    %24 = arith.addi %13, %23 : vector<1x256xi32>
    %25 = arith.select %22, %24, %13 : vector<1x256xi1>, vector<1x256xi32>
    %c15_i32 = arith.constant 15 : i32
    %26 = vector.broadcast %c15_i32 : i32 to vector<1x256xi32>
    %27 = arith.cmpi ne, %25, %26 : vector<1x256xi32>
    %28 = arith.extui %27 : vector<1x256xi1> to vector<1x256xi32>
    %29 = arith.sitofp %28 : vector<1x256xi32> to vector<1x256xf32>
    %cst_10 = arith.constant 0.000000e+00 : f32
    %30 = vector.broadcast %cst_10 : f32 to vector<4x1xf32>
    %31 = vector.extract_strided_slice %8 {offsets = [0, 1], sizes = [4, 255], strides = [1, 1]} : vector<4x256xf32> to vector<4x255xf32>
    %32 = tpu.concatenate %31, %30 in 1 : vector<4x255xf32>, vector<4x1xf32> -> vector<4x256xf32>
    %33 = vector.broadcast %29 : vector<1x256xf32> to vector<4x256xf32>
    %34 = arith.mulf %32, %33 : vector<4x256xf32>
    %cst_11 = arith.constant 0.000000e+00 : f32
    %35 = vector.broadcast %cst_11 : f32 to vector<4x16xf32>
    %36 = vector.extract_strided_slice %8 {offsets = [0, 16], sizes = [4, 240], strides = [1, 1]} : vector<4x256xf32> to vector<4x240xf32>
    %37 = tpu.concatenate %36, %35 in 1 : vector<4x240xf32>, vector<4x16xf32> -> vector<4x256xf32>
    %cst_12 = arith.constant 0.000000e+00 : f32
    %38 = vector.broadcast %cst_12 : f32 to vector<4x17xf32>
    %39 = vector.extract_strided_slice %8 {offsets = [0, 17], sizes = [4, 239], strides = [1, 1]} : vector<4x256xf32> to vector<4x239xf32>
    %40 = tpu.concatenate %39, %38 in 1 : vector<4x239xf32>, vector<4x17xf32> -> vector<4x256xf32>
    %41 = vector.broadcast %29 : vector<1x256xf32> to vector<4x256xf32>
    %42 = arith.mulf %40, %41 : vector<4x256xf32>
    %c0_13 = arith.constant 0 : index
    %c0_14 = arith.constant 0 : index
    %43 = vector.load %arg4[%c0_13, %c0_14] : memref<16x4xf32, #tpu.memory_space<vmem>>, vector<16x4xf32>
    %cst_15 = arith.constant dense<0.000000e+00> : vector<16x256xf32>
    %44 = tpu.matmul %43, %8, %cst_15 {dimension_numbers = #tpu.dot_dimension_numbers<[1], [0], [0], [1], [0, 0, 1, 1], [], []>} : vector<16x4xf32>, vector<4x256xf32>, vector<16x256xf32> -> vector<16x256xf32>
    %c0_16 = arith.constant 0 : index
    %c0_17 = arith.constant 0 : index
    %45 = vector.load %arg5[%c0_16, %c0_17] : memref<8x4xf32, #tpu.memory_space<vmem>>, vector<8x4xf32>
    %cst_18 = arith.constant dense<0.000000e+00> : vector<8x256xf32>
    %46 = tpu.matmul %45, %34, %cst_18 {dimension_numbers = #tpu.dot_dimension_numbers<[1], [0], [0], [1], [0, 0, 1, 1], [], []>} : vector<8x4xf32>, vector<4x256xf32>, vector<8x256xf32> -> vector<8x256xf32>
    %c0_19 = arith.constant 0 : index
    %c0_20 = arith.constant 0 : index
    %47 = vector.load %arg6[%c0_19, %c0_20] : memref<8x4xf32, #tpu.memory_space<vmem>>, vector<8x4xf32>
    %cst_21 = arith.constant dense<0.000000e+00> : vector<8x256xf32>
    %48 = tpu.matmul %47, %37, %cst_21 {dimension_numbers = #tpu.dot_dimension_numbers<[1], [0], [0], [1], [0, 0, 1, 1], [], []>} : vector<8x4xf32>, vector<4x256xf32>, vector<8x256xf32> -> vector<8x256xf32>
    %c0_22 = arith.constant 0 : index
    %c0_23 = arith.constant 0 : index
    %49 = vector.load %arg7[%c0_22, %c0_23] : memref<4x4xf32, #tpu.memory_space<vmem>>, vector<4x4xf32>
    %cst_24 = arith.constant dense<0.000000e+00> : vector<4x256xf32>
    %50 = tpu.matmul %49, %42, %cst_24 {dimension_numbers = #tpu.dot_dimension_numbers<[1], [0], [0], [1], [0, 0, 1, 1], [], []>} : vector<4x4xf32>, vector<4x256xf32>, vector<4x256xf32> -> vector<4x256xf32>
    %c0_25 = arith.constant 0 : index
    %c0_26 = arith.constant 0 : index
    %51 = vector.load %arg8[%c0_25, %c0_26] : memref<4x1xf32, #tpu.memory_space<vmem>>, vector<4x1xf32>
    %52 = vector.extract_strided_slice %44 {offsets = [0, 0], sizes = [4, 256], strides = [1, 1]} : vector<16x256xf32> to vector<4x256xf32>
    %53 = vector.broadcast %51 : vector<4x1xf32> to vector<4x256xf32>
    %54 = arith.addf %52, %53 : vector<4x256xf32>
    %cst_27 = arith.constant 0.000000e+00 : f32
    %55 = vector.broadcast %cst_27 : f32 to vector<4x256xf32>
    %56 = arith.maximumf %54, %55 : vector<4x256xf32>
    %57 = vector.extract_strided_slice %44 {offsets = [4, 0], sizes = [4, 256], strides = [1, 1]} : vector<16x256xf32> to vector<4x256xf32>
    %58 = vector.extract_strided_slice %46 {offsets = [0, 0], sizes = [4, 256], strides = [1, 1]} : vector<8x256xf32> to vector<4x256xf32>
    %59 = arith.addf %57, %58 : vector<4x256xf32>
    %60 = vector.broadcast %51 : vector<4x1xf32> to vector<4x256xf32>
    %61 = arith.addf %59, %60 : vector<4x256xf32>
    %cst_28 = arith.constant 0.000000e+00 : f32
    %62 = vector.broadcast %cst_28 : f32 to vector<4x256xf32>
    %63 = arith.maximumf %61, %62 : vector<4x256xf32>
    %64 = vector.extract_strided_slice %44 {offsets = [8, 0], sizes = [4, 256], strides = [1, 1]} : vector<16x256xf32> to vector<4x256xf32>
    %65 = vector.extract_strided_slice %48 {offsets = [0, 0], sizes = [4, 256], strides = [1, 1]} : vector<8x256xf32> to vector<4x256xf32>
    %66 = arith.addf %64, %65 : vector<4x256xf32>
    %67 = vector.broadcast %51 : vector<4x1xf32> to vector<4x256xf32>
    %68 = arith.addf %66, %67 : vector<4x256xf32>
    %cst_29 = arith.constant 0.000000e+00 : f32
    %69 = vector.broadcast %cst_29 : f32 to vector<4x256xf32>
    %70 = arith.maximumf %68, %69 : vector<4x256xf32>
    %71 = vector.extract_strided_slice %44 {offsets = [12, 0], sizes = [4, 256], strides = [1, 1]} : vector<16x256xf32> to vector<4x256xf32>
    %72 = vector.extract_strided_slice %46 {offsets = [4, 0], sizes = [4, 256], strides = [1, 1]} : vector<8x256xf32> to vector<4x256xf32>
    %73 = arith.addf %71, %72 : vector<4x256xf32>
    %74 = vector.extract_strided_slice %48 {offsets = [4, 0], sizes = [4, 256], strides = [1, 1]} : vector<8x256xf32> to vector<4x256xf32>
    %75 = arith.addf %73, %74 : vector<4x256xf32>
    %76 = arith.addf %75, %50 : vector<4x256xf32>
    %77 = vector.broadcast %51 : vector<4x1xf32> to vector<4x256xf32>
    %78 = arith.addf %76, %77 : vector<4x256xf32>
    %cst_30 = arith.constant 0.000000e+00 : f32
    %79 = vector.broadcast %cst_30 : f32 to vector<4x256xf32>
    %80 = arith.maximumf %78, %79 : vector<4x256xf32>
    %81 = tpu.concatenate %56, %63, %70, %80 in 1 : vector<4x256xf32>, vector<4x256xf32>, vector<4x256xf32>, vector<4x256xf32> -> vector<4x1024xf32>
    %c0_31 = arith.constant 0 : index
    %c0_32 = arith.constant 0 : index
    %82 = vector.load %arg9[%c0_31, %c0_32] : memref<8x4xf32, #tpu.memory_space<vmem>>, vector<8x4xf32>
    %cst_33 = arith.constant dense<0.000000e+00> : vector<8x1024xf32>
    %83 = tpu.matmul %82, %81, %cst_33 {dimension_numbers = #tpu.dot_dimension_numbers<[1], [0], [0], [1], [0, 0, 1, 1], [], []>} : vector<8x4xf32>, vector<4x1024xf32>, vector<8x1024xf32> -> vector<8x1024xf32>
    %c0_34 = arith.constant 0 : index
    %c0_35 = arith.constant 0 : index
    %84 = vector.load %arg10[%c0_34, %c0_35] : memref<8x1xf32, #tpu.memory_space<vmem>>, vector<8x1xf32>
    %85 = vector.broadcast %84 : vector<8x1xf32> to vector<8x1024xf32>
    %86 = arith.addf %83, %85 : vector<8x1024xf32>
    %cst_36 = arith.constant 0.000000e+00 : f32
    %87 = vector.broadcast %cst_36 : f32 to vector<8x1024xf32>
    %88 = arith.maximumf %86, %87 : vector<8x1024xf32>
    %89 = vector.extract_strided_slice %88 {offsets = [0, 0], sizes = [8, 256], strides = [1, 1]} : vector<8x1024xf32> to vector<8x256xf32>
    %c0_37 = arith.constant 0 : index
    %c0_38 = arith.constant 0 : index
    %c0_39 = arith.constant 0 : index
    %c0_40 = arith.constant 0 : index
    %90 = vector.load %arg11[%c0_37, %c0_38, %c0_39, %c0_40] : memref<1x4x8x256xf32, #tpu.memory_space<vmem>>, vector<1x1x8x256xf32>
    %91 = vector.shape_cast %90 : vector<1x1x8x256xf32> to vector<8x256xf32>
    %92 = vector.shape_cast %89 : vector<8x256xf32> to vector<1x1x8x256xf32>
    tpu.vector_store %arg11[%c0_37, %c0_38, %c0_39, %c0_40], %92 {strides = array<i32>} : memref<1x4x8x256xf32, #tpu.memory_space<vmem>>, vector<1x1x8x256xf32>,
    %93 = vector.extract_strided_slice %88 {offsets = [0, 256], sizes = [8, 256], strides = [1, 1]} : vector<8x1024xf32> to vector<8x256xf32>
    %c0_41 = arith.constant 0 : index
    %c1 = arith.constant 1 : index
    %c0_42 = arith.constant 0 : index
    %c0_43 = arith.constant 0 : index
    %94 = vector.load %arg11[%c0_41, %c1, %c0_42, %c0_43] : memref<1x4x8x256xf32, #tpu.memory_space<vmem>>, vector<1x1x8x256xf32>
    %95 = vector.shape_cast %94 : vector<1x1x8x256xf32> to vector<8x256xf32>
    %96 = vector.shape_cast %93 : vector<8x256xf32> to vector<1x1x8x256xf32>
    tpu.vector_store %arg11[%c0_41, %c1, %c0_42, %c0_43], %96 {strides = array<i32>} : memref<1x4x8x256xf32, #tpu.memory_space<vmem>>, vector<1x1x8x256xf32>,
    %97 = vector.extract_strided_slice %88 {offsets = [0, 512], sizes = [8, 256], strides = [1, 1]} : vector<8x1024xf32> to vector<8x256xf32>
    %c0_44 = arith.constant 0 : index
    %c2 = arith.constant 2 : index
    %c0_45 = arith.constant 0 : index
    %c0_46 = arith.constant 0 : index
    %98 = vector.load %arg11[%c0_44, %c2, %c0_45, %c0_46] : memref<1x4x8x256xf32, #tpu.memory_space<vmem>>, vector<1x1x8x256xf32>
    %99 = vector.shape_cast %98 : vector<1x1x8x256xf32> to vector<8x256xf32>
    %100 = vector.shape_cast %97 : vector<8x256xf32> to vector<1x1x8x256xf32>
    tpu.vector_store %arg11[%c0_44, %c2, %c0_45, %c0_46], %100 {strides = array<i32>} : memref<1x4x8x256xf32, #tpu.memory_space<vmem>>, vector<1x1x8x256xf32>,
    %101 = vector.extract_strided_slice %88 {offsets = [0, 768], sizes = [8, 256], strides = [1, 1]} : vector<8x1024xf32> to vector<8x256xf32>
    %c0_47 = arith.constant 0 : index
    %c3 = arith.constant 3 : index
    %c0_48 = arith.constant 0 : index
    %c0_49 = arith.constant 0 : index
    %102 = vector.load %arg11[%c0_47, %c3, %c0_48, %c0_49] : memref<1x4x8x256xf32, #tpu.memory_space<vmem>>, vector<1x1x8x256xf32>
    %103 = vector.shape_cast %102 : vector<1x1x8x256xf32> to vector<8x256xf32>
    %104 = vector.shape_cast %101 : vector<8x256xf32> to vector<1x1x8x256xf32>
    tpu.vector_store %arg11[%c0_47, %c3, %c0_48, %c0_49], %104 {strides = array<i32>} : memref<1x4x8x256xf32, #tpu.memory_space<vmem>>, vector<1x1x8x256xf32>,
    return
  }
  func.func @transform_0(%arg0: i32) -> (i32, i32, i32) {
    %c0_i32 = arith.constant 0 : i32
    %c0_i32_0 = arith.constant 0 : i32
    %c0_i32_1 = arith.constant 0 : i32
    return %arg0, %c0_i32, %c0_i32_0 : i32, i32, i32
  }
  func.func @transform_1(%arg0: i32) -> (i32, i32) {
    %c0_i32 = arith.constant 0 : i32
    %c0_i32_0 = arith.constant 0 : i32
    %c0_i32_1 = arith.constant 0 : i32
    return %c0_i32, %c0_i32_0 : i32, i32
  }
  func.func @transform_2(%arg0: i32) -> (i32, i32) {
    %c0_i32 = arith.constant 0 : i32
    %c0_i32_0 = arith.constant 0 : i32
    %c0_i32_1 = arith.constant 0 : i32
    return %c0_i32, %c0_i32_0 : i32, i32
  }
  func.func @transform_3(%arg0: i32) -> (i32, i32) {
    %c0_i32 = arith.constant 0 : i32
    %c0_i32_0 = arith.constant 0 : i32
    %c0_i32_1 = arith.constant 0 : i32
    return %c0_i32, %c0_i32_0 : i32, i32
  }
  func.func @transform_4(%arg0: i32) -> (i32, i32) {
    %c0_i32 = arith.constant 0 : i32
    %c0_i32_0 = arith.constant 0 : i32
    %c0_i32_1 = arith.constant 0 : i32
    return %c0_i32, %c0_i32_0 : i32, i32
  }
  func.func @transform_5(%arg0: i32) -> (i32, i32) {
    %c0_i32 = arith.constant 0 : i32
    %c0_i32_0 = arith.constant 0 : i32
    %c0_i32_1 = arith.constant 0 : i32
    return %c0_i32, %c0_i32_0 : i32, i32
  }
  func.func @transform_6(%arg0: i32) -> (i32, i32) {
    %c0_i32 = arith.constant 0 : i32
    %c0_i32_0 = arith.constant 0 : i32
    %c0_i32_1 = arith.constant 0 : i32
    return %c0_i32, %c0_i32_0 : i32, i32
  }
  func.func @transform_7(%arg0: i32) -> (i32, i32) {
    %c0_i32 = arith.constant 0 : i32
    %c0_i32_0 = arith.constant 0 : i32
    %c0_i32_1 = arith.constant 0 : i32
    return %c0_i32, %c0_i32_0 : i32, i32
  }
  func.func @transform_8(%arg0: i32) -> (i32, i32) {
    %c0_i32 = arith.constant 0 : i32
    %c0_i32_0 = arith.constant 0 : i32
    %c0_i32_1 = arith.constant 0 : i32
    return %c0_i32, %c0_i32_0 : i32, i32
  }
  func.func @transform_9(%arg0: i32) -> (i32, i32) {
    %c0_i32 = arith.constant 0 : i32
    %c0_i32_0 = arith.constant 0 : i32
    %c0_i32_1 = arith.constant 0 : i32
    return %c0_i32, %c0_i32_0 : i32, i32
  }
  func.func @transform_10(%arg0: i32) -> (i32, i32, i32, i32) {
    %c0_i32 = arith.constant 0 : i32
    %c0_i32_0 = arith.constant 0 : i32
    %c0_i32_1 = arith.constant 0 : i32
    %c0_i32_2 = arith.constant 0 : i32
    return %arg0, %c0_i32, %c0_i32_0, %c0_i32_1 : i32, i32, i32, i32
  }
}

</mosaic_0001>

<bundles_post_ra>
// kernel: tpu_custom_call.1
= control target key start
LH: loop header
LB: loop body
LE: loop exit
PB: predicated region body
PF: predicated region fallthrough
CT: control target
= control target key end

     0   :  { %15 = vsyncpa [#allocation3], 0  ;;  %s1708_s0 = inlined_call_operand.vmem [shape: f32[2,16,256], index: 0, kind: input, shape index: {}]   ;;  %s1709_s1 = inlined_call_operand.vmem [shape: f32[4,16], index: 1, kind: input, shape index: {}]   ;;  %s1710_s2 = inlined_call_operand.vmem [shape: f32[4,1], index: 2, kind: input, shape index: {}]   ;;  %s1711_s3 = inlined_call_operand.vmem [shape: f32[16,4], index: 3, kind: input, shape index: {}]   ;;  %s1712_s4 = inlined_call_operand.vmem [shape: f32[8,4], index: 4, kind: input, shape index: {}]   ;;  %s1713_s5 = inlined_call_operand.vmem [shape: f32[8,4], index: 5, kind: input, shape index: {}]   ;;  %s1714_s6 = inlined_call_operand.vmem [shape: f32[4,4], index: 6, kind: input, shape index: {}]   ;;  %s1715_s7 = inlined_call_operand.vmem [shape: f32[4,1], index: 7, kind: input, shape index: {}]   ;;  %s1716_s8 = inlined_call_operand.vmem [shape: f32[8,4], index: 8, kind: input, shape index: {}]   ;;  %s1717_s9 = inlined_call_operand.vmem [shape: f32[8,1], index: 9, kind: input, shape index: {}]   ;;  %s1718_s10 = inlined_call_operand.hbm [shape: f32[2,4,8,256], index: 10, kind: output, shape index: {}]  }
   0x1   :  { %17 = vsyncpa [#allocation3 + $0x1], 0  ;;  %s1534_s13 = smov 0   ;;  %s1536_s14 = smov 0  }
   0x2   :  { %s1538_s15 = smov 0   ;;  %s1540_s16 = smov 0  }
   0x3 LB: > { %s1555_s17 = sadd.s32 4294967295, %s1469_s16   ;;  %s1307_s18 = sadd.s32 4294967294, %s1469_s16   ;;  %s1469_s16 = sphi %s1540_s16, %s1724_s16   ;;  %s1465_s15 = sphi %s1538_s15, %s1723_s15   ;;  %s1461_s14 = sphi %s1536_s14, %s1722_s14   ;;  %s1457_s13 = sphi %s1534_s13, %s1721_s13  }
   0x4   : > { %s1559_s19 = sadd.s32 1, %s1469_s16   ;;  %s245_s20 = sadd.s32 1, %s1465_s15 }
   0x5   : > { %s242_s21 = ssub.s32 %s1469_s16, %s1559_s19  ;;  %p255_p0 = scmp.ne.s32.totalorder %s1465_s15, %s1461_s14 }
   0x6   : > { %p243_p1 = scmp.eq.s32.totalorder %s242_s21, 0  ;;  %p256_p2 = scmp.eq.s32.totalorder %s1555_s17, 1 }
   0x7   : > { %p261_p3 = scmp.ne.s32.totalorder %s1461_s14, %s1457_s13  ;;  %p262_p4 = scmp.eq.s32.totalorder %s1307_s18, 1 }
   0x8   : > { %s1570_s22 = scalar_select %p243_p1, %s1465_s15, %s245_s20  }
   0x9   : > { %p1572_p5 = por %p256_p2, %p255_p0  ;;  %p1576_p6 = por %p262_p4, %p261_p3 }
   0xa   : > { %p1310_p7 = scmp.ge.s32.totalorder %s1469_s16, 1  ;;  %p315_p8 = scmp.lt.s32.totalorder %s1469_s16, 3 }
   0xc   : > { %p316_p9 = pnand %p1310_p7, %p315_p8 }
   0xd   : > { %p353_p10 = scmp.lt.s32.totalorder (!%p316_p9), %s1555_s17, 1  ;;  %v1471_v0 = vmov (!%p316_p9), 0.0   ;;  %v1472_v1 = vmov (!%p316_p9), 0   ;;  %v363_v2 = vld [vmem:[%s1710_s2] sm:$0xf] (!%p316_p9)  ;;  %vm369_vm0 = vcmask (!%p316_p9), 130048   ;;  %v446_v21 = vlaneseq (!%p316_p9) }
   0xe   : > { %319 = sbr.rel (%p316_p9) target bundleno = 831 (0x33f), region = 60  ;;  %437 = vmatprep.mubr.f32.mxu0 (!%p316_p9), %v1471_v0  ;;  %1405 = vset.pattern.permute.xlu0 (!%p316_p9), %v1472_v1  ;;  %v362_v9 = vld [vmem:[%s1709_s1] sm:$0xf] (!%p316_p9)  ;;  %vm520_vm1 = vcmask (!%p316_p9), 1043456   ;;  %s1473_s20 = smov (!%p316_p9), 127   ;;  %vm513_vm2 = vcmask (!%p316_p9), 31744  }
   0xf   : > { %366 = vperm.xlu0 (!%p316_p9), %1405, %v363_v2   ;;  %589 = vmatprep.mubr.f32.mxu1 (!%p316_p9), %v1471_v0  ;;  %v511_v17 = vld [vmem:[%s1711_s3] sm:$0xff] (!%p316_p9)  ;;  %s1474_s26 = smov (!%p316_p9), 111   ;;  %v512_v18 = vld [vmem:[%s1711_s3 + $0x8] sm:$0xff] (!%p316_p9)  ;;  %s1475_s29 = smov (!%p316_p9), 112   ;;  %v447_v22 = vand.u32 (!%p316_p9), 127, %v446_v21  ;;  %vm485_vm5 = vcmask (!%p316_p9), 1039360  }
  0x10   : > { %1406 = vset.pattern.permute.xlu1 (!%p316_p9), %v1472_v1  ;;  %v844_v19 = vld [vmem:[%s1715_s7] sm:$0xf] (!%p316_p9)  ;;  %vm504_vm6 = vcmask (!%p316_p9), 908288   ;;  %vm496_vm7 = vcmask (!%p316_p9), 916480  }
  0x11   : > { %v899_v20 = vld [vmem:[%s1717_s9] sm:$0xff] (!%p316_p9)  ;;  %v448_v23 = vadd.s32 (!%p316_p9), 128, %v447_v22  ;;  %v453_v24 = vand.u32 (!%p316_p9), 15, %v447_v22 }
  0x12   : > { %v602_v35 = vld [vmem:[%s1712_s4] sm:$0xff] (!%p316_p9) }
  0x13   : > { %v460_v25 = vand.u32 (!%p316_p9), 15, %v448_v23  ;;  %vm473_vm3 = vcmp.ne.s32.totalorder (!%p316_p9), %v453_v24, 15  ;;  %v763_v42 = vld [vmem:[%s1714_s6] sm:$0xf] (!%p316_p9) }
  0x14   : > { %v1315_v27 = vsel (!%p316_p9), %vm473_vm3, 1.0, %v1471_v0  ;;  %v683_v45 = vld [vmem:[%s1713_s5] sm:$0xff] (!%p316_p9) }
  0x15   : > { %s354_s27 = scalar_select %p353_p10, %s1555_s17, 1  ;;  %vm474_vm4 = vcmp.ne.s32.totalorder %v460_v25, 15  ;;  %v898_v55 = vld [vmem:[%s1716_s8] sm:$0xff] }
  0x16   : > { %v1316_v28 = vsel %vm474_vm4, 1.0, %v1471_v0 }
  0x17   : > { %s1353_s28 = sshll.u32 %s354_s27, 5 }
  0x18   : > { %s357_s11 = scalar_lea.vmem %s1708_s0, %s1353_s28 }
  0x19   : > { %v359_v3 = vld [vmem:[%s357_s11 + $0x8] sm:$0xff]  ;;  %v361_v4 = vld [vmem:[%s357_s11 + $0x18] sm:$0xff]  ;;  %v358_v5 = vld [vmem:[%s357_s11] sm:$0xff] }
  0x1a   : > { %v1355_v6 = vpack.c.bf16 %v361_v4, %v359_v3  ;;  %v360_v7 = vld [vmem:[%s357_s11 + $0x10] sm:$0xff]  ;;  %s350_s11 = sand.u32 1, %s1461_s14  }
  0x1b   : > { %v1357_v8 = vpack.c.bf16 %v360_v7, %v358_v5  ;;  %s1311_s12 = sshll.u32 %s350_s11, 6 }
  0x1c   : > { %1356 = vmatprep.subr.bf16.mxu0 %v1355_v6  ;;  %s352_s18 = scalar_lea.vmem [#allocation2], %s1311_s12 }
  0x1d   : > { %1358 = vmatpush1.bf16.msra.mxu0 %v1357_v8  ;;  %s1245_s21 = sshll.u32 %s352_s18, 4  ;;  %s1663_s21 = int_to_ptr.vmem [resolvable:$true] %s1245_s21 }
  0x1e   : > { %s1407_s28 = scalar_lea.vmem %s1663_s21, 1024 }
  0x1f   : > { %p1408_p11 = scmp.ne.s32.totalorder %s1663_s21, %s1407_s28 }
  0x20   : > { %1314 = vmatmul.mubr.msk.f32.vlgmr.msra.gmra.mrb[0].mxu0 %vm369_vm0, %v362_v9 }
  0x21   : > { %676 = vmatprep.mubr.f32.mxu0 %v1471_v0  ;;  %p1409_p12 = pnand %p1408_p11, %p1572_p5 }
  0x23   : > { %p1410_p13 = pneg %p1409_p12 }
  0x8e   : > { %v367_v10 = vpop.permute.xlu0 %366 }
  0xf3   : > { %v439_v11 = vpop.f32.mrb[0].mxu0 }
  0xf4   : > { %v440_v12 = vadd.f32 %v439_v11, %v367_v10  ;;  %v441_v13 = vpop.f32.mrb[1].mxu0 }
  0xf5   : > { %v442_v14 = vadd.f32 %v441_v13, %v367_v10 }
  0xf6   : > { %v444_v15 = vmax.f32 %v440_v12, 0.0 }
  0xf7   : > { %v445_v16 = vmax.f32 %v442_v14, 0.0 }
  0xf8   : > { %481 = vrot.lane.b32.xlu1 %v444_v15, %s1473_s20 }
  0xf9   : > { %483 = vrot.lane.b32.xlu0 %v445_v16, %s1473_s20  ;;  %1317 = vmatprep.subr.msk.mxu1 %vm520_vm1, %v445_v16  ;;  %s1354_s20 = sshll.u32 %s1555_s17, 10  ;;  %s1667_s17 = scalar_lea.sflag [#allocation3], %s350_s11 }
  0xfa   : > { %1318 = vmatpush1.msk.msra.mxu1 %vm520_vm1, %v444_v15  ;;  %s1661_s27 = scalar_lea.hbm %s1718_s10, %s1354_s20 }
  0xfb   : > { %1319 = vmatmul.mubr.msk.f32.vlgmr.msra.gmra.mrb[0].mxu1 %vm513_vm2, %v511_v17 }
  0xfc   : > { %502 = vrot.lane.b32.xlu1 %v445_v16, %s1474_s26  ;;  %595 = vmatprep.mubr.f32.mxu1 %v1471_v0 }
  0xfd   : > { %500 = vrot.lane.b32.xlu0 %v444_v15, %s1474_s26 }
  0xff   : > { %1320 = vmatmul.mubr.msk.f32.gmra.mrb[2].mxu1 %vm513_vm2, %v512_v18 }
 0x100   : > { %494 = vrot.lane.b32.xlu1 %v445_v16, %s1475_s29  ;;  %756 = vmatprep.mubr.f32.mxu1 %v1471_v0 }
 0x101   : > { %492 = vrot.lane.b32.xlu0 %v444_v15, %s1475_s29  ;;  %s1476_s29 = smov [#allocation2]  }
 0x102   : > { %s1411_s30 = sshll.u32 %s1476_s29, 4  ;;  %s1412_s30 = int_to_ptr.vmem [resolvable:$false] %s1411_s30 }
 0x103   : > { %s1413_s12 = scalar_lea.vmem %s1412_s30, 2048  ;;  %p1414_p0 = scmp.lt.s32.totalorder %s1663_s21, %s1412_s30 }
 0x104   : > { %847 = vperm.xlu1 %1406, %v844_v19   ;;  %p1415_p1 = scmp.lt.s32.totalorder %s1413_s12, %s1407_s28 }
 0x105   : > { %902 = vperm.xlu0 %1405, %v899_v20  }
 0x106   : > { %p1416_p2 = por %p1415_p1, %p1414_p0 }
 0x108   : > { %p1417_p3 = pnand %p1416_p2, %p1410_p13 }
 0x16a   : > { %v482_v26 = vpop.permute.xlu1 %481 }
 0x16b   : > { %v484_v29 = vpop.permute.xlu0 %483 }
 0x16c   : > { %v486_v30 = vsel %vm485_vm5, %v482_v26, %v484_v29  ;;  %v489_v31 = vsel %vm485_vm5, %v484_v29, 0.0 }
 0x16d   : > { %v490_v32 = vmul.f32 %v1315_v27, %v486_v30  ;;  %v491_v33 = vmul.f32 %v1316_v28, %v489_v31 }
 0x16e   : > { %v503_v34 = vpop.permute.xlu1 %502 }
 0x16f   : > { %v508_v36 = vsel %vm504_vm6, %v503_v34, 0.0  ;;  %1321 = vmatprep.subr.msk.mxu0 %vm520_vm1, %v491_v33  ;;  %v501_v37 = vpop.permute.xlu0 %500 }
 0x170   : > { %v510_v38 = vmul.f32 %v1316_v28, %v508_v36  ;;  %v505_v39 = vsel %vm504_vm6, %v501_v37, %v503_v34  ;;  %1322 = vmatpush1.msk.msra.mxu0 %vm520_vm1, %v490_v32 }
 0x171   : > { %v509_v40 = vmul.f32 %v1315_v27, %v505_v39  ;;  %1323 = vmatmul.mubr.msk.f32.vlgmr.msra.gmra.mrb[2].mxu0 %vm513_vm2, %v602_v35 }
 0x172   : > { %1327 = vmatprep.subr.msk.mxu0 %vm520_vm1, %v510_v38  ;;  %v495_v41 = vpop.permute.xlu1 %494  ;;  %837 = vmatprep.mubr.f32.mxu0 %v1471_v0 }
 0x173   : > { %v499_v43 = vsel %vm496_vm7, %v495_v41, 0.0  ;;  %v493_v44 = vpop.permute.xlu0 %492  ;;  %1328 = vmatpush1.msk.msra.mxu0 %vm520_vm1, %v509_v40 }
 0x174   : > { %v497_v46 = vsel %vm496_vm7, %v493_v44, %v495_v41  ;;  %1324 = vmatprep.subr.msk.mxu1 %vm520_vm1, %v499_v43 }
 0x175   : > { %1325 = vmatpush1.msk.msra.mxu1 %vm520_vm1, %v497_v46  ;;  %1329 = vmatmul.mubr.msk.f32.vlgmr.msra.gmra.mrb[4].mxu0 %vm513_vm2, %v763_v42 }
 0x176   : > { %1326 = vmatmul.mubr.msk.f32.vlgmr.msra.gmra.mrb[4].mxu1 %vm513_vm2, %v683_v45  ;;  %1063 = vmatprep.mubr.f32.mxu0 %v1471_v0 }
 0x177   : > { %992 = vmatprep.mubr.f32.mxu1 %v1471_v0 }
 0x183   : > { %v848_v47 = vpop.permute.xlu1 %847 }
 0x184   : > { %v862_v58 = vrot.slane %v848_v47, 4  ;;  %v903_v31 = vpop.permute.xlu0 %902 }
 0x1ce   : > { %v591_v48 = vpop.f32.mrb[0].mxu1 }
 0x1cf   : > { %v850_v49 = vadd.f32 %v848_v47, %v591_v48  ;;  %v593_v50 = vpop.f32.mrb[1].mxu1 }
 0x1d0   : > { %v851_v51 = vadd.f32 %v848_v47, %v593_v50 }
 0x1d1   : > { %v852_v52 = vmax.f32 %v850_v49, 0.0 }
 0x1d2   : > { %v853_v53 = vmax.f32 %v851_v51, 0.0  ;;  %v597_v54 = vpop.f32.mrb[2].mxu1 }
 0x1d3   : > { %v599_v56 = vpop.f32.mrb[3].mxu1 }
 0x1d4   : > { %1330 = vmatprep.subr.msk.mxu1 %vm520_vm1, %v853_v53 }
 0x1d5   : > { %1331 = vmatpush1.msk.msra.mxu1 %vm520_vm1, %v852_v52 }
 0x1d6   : > { %1332 = vmatmul.mubr.msk.f32.vlgmr.msra.gmra.mrb[6].mxu1 %vm513_vm2, %v898_v55 }
 0x1d7   : > { %1134 = vmatprep.mubr.f32.mxu1 %v1471_v0 }
 0x244   : > { %v678_v57 = vpop.f32.mrb[2].mxu0 }
 0x245   : > { %v856_v59 = vrot.slane %v678_v57, 4  ;;  %v680_v60 = vpop.f32.mrb[3].mxu0  ;;  %v874_v61 = vadd.f32 %v678_v57, %v597_v54 }
 0x246   : > { %v857_v62 = vrot.slane %v680_v60, 4  ;;  %v875_v63 = vadd.f32 %v680_v60, %v599_v56 }
 0x247   : > { %v860_v1 = vadd.f32 %v856_v59, %v591_v48 }
 0x248   : > { %v861_v2 = vadd.f32 %v857_v62, %v593_v50  ;;  %v839_v3 = vpop.f32.mrb[4].mxu0 }
 0x249   : > { %v864_v4 = vadd.f32 %v862_v58, %v860_v1  ;;  %v758_v5 = vpop.f32.mrb[4].mxu1  ;;  %v880_v6 = vrot.slane %v839_v3, 4  ;;  %v841_v7 = vpop.f32.mrb[5].mxu0 }
 0x24a   : > { %v865_v8 = vadd.f32 %v862_v58, %v861_v2  ;;  %v868_v9 = vadd.f32 %v758_v5, %v597_v54  ;;  %v876_v10 = vadd.f32 %v874_v61, %v758_v5  ;;  %v760_v11 = vpop.f32.mrb[5].mxu1  ;;  %v881_v12 = vrot.slane %v841_v7, 4 }
 0x24b   : > { %v866_v13 = vmax.f32 %v864_v4, 0.0  ;;  %v869_v14 = vadd.f32 %v760_v11, %v599_v56  ;;  %v877_v15 = vadd.f32 %v875_v63, %v760_v11 }
 0x24c   : > { %v867_v16 = vmax.f32 %v865_v8, 0.0  ;;  %v870_v17 = vadd.f32 %v868_v9, %v848_v47  ;;  %v884_v18 = vadd.f32 %v880_v6, %v876_v10 }
 0x24d   : > { %v871_v19 = vadd.f32 %v869_v14, %v848_v47  ;;  %v885_v20 = vadd.f32 %v881_v12, %v877_v15  ;;  %v892_v23 = vrot.slane %v866_v13, 4 }
 0x24e   : > { %v893_v21 = vrot.slane %v867_v16, 4  ;;  %v886_v22 = vadd.f32 %v884_v18, %v862_v58  ;;  %v872_v26 = vmax.f32 %v870_v17, 0.0 }
 0x24f   : > { %v873_v24 = vmax.f32 %v871_v19, 0.0  ;;  %v887_v25 = vadd.f32 %v885_v20, %v862_v58 }
 0x250   : > { %v888_v27 = vmax.f32 %v886_v22, 0.0  ;;  %1333 = vmatprep.subr.msk.mxu0 %vm520_vm1, %v893_v21 }
 0x251   : > { %v889_v28 = vmax.f32 %v887_v25, 0.0  ;;  %1334 = vmatpush1.msk.msra.mxu0 %vm520_vm1, %v892_v23  ;;  %1336 = vmatprep.subr.msk.mxu1 %vm520_vm1, %v873_v24 }
 0x252   : > { %1335 = vmatmul.mubr.msk.f32.vlgmr.msra.gmra.mrb[6].mxu0 %vm513_vm2, %v898_v55  ;;  %1337 = vmatpush1.msk.msra.mxu1 %vm520_vm1, %v872_v26  ;;  %v896_v30 = vrot.slane %v888_v27, 4 }
 0x253   : > { %v897_v29 = vrot.slane %v889_v28, 4  ;;  %1338 = vmatmul.mubr.msk.f32.vlgmr.msra.gmra.mrb[8].mxu1 %vm513_vm2, %v898_v55  ;;  %1205 = vmatprep.mubr.f32.mxu0 %v1471_v0 }
 0x255   : > { %1339 = vmatprep.subr.msk.mxu0 %vm520_vm1, %v897_v29 }
 0x256   : > { %1340 = vmatpush1.msk.msra.mxu0 %vm520_vm1, %v896_v30 }
 0x257   : > { %1341 = vmatmul.mubr.msk.f32.vlgmr.msra.gmra.mrb[8].mxu0 %vm513_vm2, %v898_v55 }
 0x2a9   : > { %v994_v32 = vpop.f32.mrb[6].mxu1 }
 0x2aa   : > { %v995_v33 = vadd.f32 %v994_v32, %v903_v31  ;;  %v996_v34 = vpop.f32.mrb[7].mxu1 }
 0x2ab   : > { %v997_v35 = vadd.f32 %v996_v34, %v903_v31 }
 0x2ac   : > { %v1212_v36 = vmax.f32 %v995_v33, 0.0 }
 0x2ad   : > { %v1213_v37 = vmax.f32 %v997_v35, 0.0 }
 0x2ae   : > { %1220 = vst [vmem:[%s352_s18] sm:$0xff] %v1212_v36 }
 0x2af   : > { %1221 = vst [vmem:[%s352_s18 + $0x8] sm:$0xff] %v1213_v37 }
 0x325   : > { %v1065_v0 = vpop.f32.mrb[6].mxu0 }
 0x326   : > { %v1066_v38 = vadd.f32 %v1065_v0, %v903_v31  ;;  %v1067_v39 = vpop.f32.mrb[7].mxu0  ;;  %v1136_v40 = vpop.f32.mrb[8].mxu1 }
 0x327   : > { %v1068_v41 = vadd.f32 %v1067_v39, %v903_v31  ;;  %v1137_v42 = vadd.f32 %v1136_v40, %v903_v31  ;;  %v1138_v43 = vpop.f32.mrb[9].mxu1 }
 0x328   : > { %v1214_v44 = vmax.f32 %v1066_v38, 0.0  ;;  %v1139_v45 = vadd.f32 %v1138_v43, %v903_v31 }
 0x329   : > { %v1215_v46 = vmax.f32 %v1068_v41, 0.0  ;;  %v1216_v47 = vmax.f32 %v1137_v42, 0.0 }
 0x32a   : > { %1342 = vst [vmem:[%s352_s18 + $0x10] sm:$0xff] %v1214_v44  ;;  %v1217_v48 = vmax.f32 %v1139_v45, 0.0  ;;  %v1207_v49 = vpop.f32.mrb[8].mxu0 }
 0x32b   : > { %1343 = vst [vmem:[%s352_s18 + $0x18] sm:$0xff] %v1215_v46  ;;  %1344 = vst [vmem:[%s352_s18 + $0x20] sm:$0xff] %v1216_v47  ;;  %v1208_v50 = vadd.f32 %v1207_v49, %v903_v31  ;;  %v1209_v51 = vpop.f32.mrb[9].mxu0 }
 0x32c   : > { %1345 = vst [vmem:[%s352_s18 + $0x28] sm:$0xff] %v1217_v48  ;;  %v1210_v52 = vadd.f32 %v1209_v51, %v903_v31 }
 0x32d   : > { %v1218_v53 = vmax.f32 %v1208_v50, 0.0 }
 0x32e   : > { %v1219_v54 = vmax.f32 %v1210_v52, 0.0 }
 0x32f   : > { %1346 = vst [vmem:[%s352_s18 + $0x30] sm:$0xff] %v1218_v53 }
 0x330   : > { %1347 = vst [vmem:[%s352_s18 + $0x38] sm:$0xff] %v1219_v54 }
 0x331   : > { %1420 = shalt.err (!%p1417_p3)
}
 0x332   : > { %s1421_s11 = scalar_lea.hbm %s1661_s27, 1024  ;;  %s1425_s25 = scalar_lea.hbm %s1718_s10, 2048 }
 0x333   : > { %p1422_p4 = scmp.ne.s32.totalorder %s1661_s27, %s1421_s11  ;;  %p1426_p9 = scmp.lt.u32.totalorder %s1661_s27, %s1718_s10 }
 0x334   : > { %p1427_p10 = scmp.lt.u32.totalorder %s1425_s25, %s1421_s11  ;;  %p1429_p12 = scmp.lt.u32.totalorder %s1421_s11, %s1661_s27 }
 0x335   : > { %p1423_p7 = pnand %p1422_p4, %p1572_p5 }
 0x336   : > { %p1428_p11 = por %p1427_p10, %p1426_p9 }
 0x337   : > { %p1424_p8 = pneg %p1423_p7 }
 0x338   : > { %p1430_p13 = por %p1429_p12, %p1428_p11 }
 0x33a   : > { %p1431_p0 = pnand %p1430_p13, %p1424_p8 }
 0x33c   : > { %1434 = shalt.err (!%p1431_p0)
}
 0x33d   : > { %s1477_s28 = smov 256   ;;  %s1478_s30 = smov 16  }
 0x33e   : > { %1359 = dma.vmem_to_hbm [thread:$0]  (%p1572_p5), %s1663_s21, 1024, %s1661_s27, %s1667_s17, %s1477_s28, %s1477_s28, %s1478_s30  }
 0x33f PF: > { %p1365_p1 = scmp.ge.s32.totalorder %s1469_s16, 2  ;;  %s1260_s12 = sand.u32 1, %s1457_s13  }
 0x340   : > { %s1261_s11 = scalar_lea.sflag [#allocation3], %s1260_s12 }
 0x341   : > { %p1362_p2 = pnand %p1365_p1, %p1576_p6 }
 0x343   : > { %1452 = dma.done.wait (!%p1362_p2), %s1261_s11, 1024  }
 0x344   : > { %1454 = vsyncadd (!%p1362_p2), %s1261_s11, 4294966272  ;;  %p20_p3 = scmp.ge.s32.totalorder %s1559_s19, 4   ;;  %s1721_s13 = smov %s1461_s14 }
 0x345   : > { %s1722_s14 = smov %s1465_s15  ;;  %s1723_s15 = smov %s1570_s22 }
 0x346   : > { %s1724_s16 = smov %s1559_s19  ;;  %22 = sbr.rel (!%p20_p3) target bundleno = 3 (0x3), region = 98 }
 0x34d   :  { %1266 = vsyncpa [#allocation3], 1 }
 0x34e   :  { %1268 = vsyncpa [#allocation3 + $0x1], 1 }

</bundles_post_ra>
